<compile_context>
chip_gen: v7x
topology: tpu7x:2x2x1
jax: 0.10.0
libtpu: 0.0.40
codegen_flags: <defaults>
</compile_context>

<pallas_src>
import functools

import jax
import jax.numpy as jnp
from jax.experimental import pallas as pl
from jax.experimental.pallas import tpu as pltpu


METHODS = ("iou", "log_iou", "giou", "log_giou")

# Max block rows: (8, 512, 128) f32 = 2 MiB per input tile; with double
# buffering (inputs + weights + output) total VMEM stays ~5 MiB.
_BM_MAX = 512


def _round_up(x: int, m: int) -> int:
    return ((x + m - 1) // m) * m


def _compute_loss_tile(x_ref, w_ref, method: str, is_offsets: bool):
    """Per-box loss on dense (BM, 128) tiles. x_ref is (8, BM, 128)."""
    pa, pb, pc, pd = x_ref[0], x_ref[1], x_ref[2], x_ref[3]
    ta, tb, tc, td = x_ref[4], x_ref[5], x_ref[6], x_ref[7]

    if is_offsets:
        # (dl, dt, dr, db)
        inter = (jnp.minimum(pa, ta) + jnp.minimum(pc, tc)) * \
                (jnp.minimum(pb, tb) + jnp.minimum(pd, td))
        p_area = (pa + pc) * (pb + pd)
        t_area = (ta + tc) * (tb + td)
        union = p_area + t_area - inter
        if method in ("giou", "log_giou"):
            ac = (jnp.maximum(pa, ta) + jnp.maximum(pc, tc)) * \
                 (jnp.maximum(pb, tb) + jnp.maximum(pd, td))
    else:
        # (cx, cy, w, h) -- w/h are half extents, matching the reference.
        p_x1, p_x2 = pa - pc, pa + pc
        p_y1, p_y2 = pb - pd, pb + pd
        t_x1, t_x2 = ta - tc, ta + tc
        t_y1, t_y2 = tb - td, tb + td
        inter = (jnp.minimum(p_x2, t_x2) - jnp.maximum(p_x1, t_x1)) * \
                (jnp.minimum(p_y2, t_y2) - jnp.maximum(p_y1, t_y1))
        p_area = (pc * 2.0) * (pd * 2.0)
        t_area = (tc * 2.0) * (td * 2.0)
        union = p_area + t_area - inter
        if method in ("giou", "log_giou"):
            ac = (jnp.maximum(p_x2, t_x2) - jnp.minimum(p_x1, t_x1)) * \
                 (jnp.maximum(p_y2, t_y2) - jnp.minimum(p_y1, t_y1))
        # NOTE: the PyTorch reference computes (i+1)/(u+1) here and then
        # immediately overwrites it, so it is dead code and omitted.

    ious = inter / (union + 1e-08)
    if method in ("giou", "log_giou"):
        ious = ious - (ac - union) / (ac + 1e-08)

    if method in ("iou", "giou"):
        loss = 1.0 - ious
    else:  # "log_iou" / "log_giou"
        loss = -jnp.log(jnp.clip(ious, 1e-08, 1.0))

    if w_ref is not None:
        loss = loss * w_ref[...]
    return loss


def _make_perbox_kernel(method: str, is_offsets: bool, has_weights: bool):
    def kernel(*refs):
        if has_weights:
            x_ref, w_ref, o_ref = refs
        else:
            x_ref, o_ref = refs
            w_ref = None
        o_ref[...] = _compute_loss_tile(x_ref, w_ref, method, is_offsets)
    return kernel


def _make_reduce_kernel(method: str, is_offsets: bool, has_weights: bool,
                        n_valid: int, bm: int):
    def kernel(*refs):
        if has_weights:
            x_ref, w_ref, o_ref = refs
        else:
            x_ref, o_ref = refs
            w_ref = None
        loss = _compute_loss_tile(x_ref, w_ref, method, is_offsets)

        # Mask padded lanes so the fused sum is exact (box idx = row*128+lane).
        row = jax.lax.broadcasted_iota(jnp.int32, loss.shape, 0)
        lane = jax.lax.broadcasted_iota(jnp.int32, loss.shape, 1)
        idx = (pl.program_id(0) * bm + row) * 128 + lane
        loss = jnp.where(idx < n_valid, loss, 0.0)

        @pl.when(pl.program_id(0) == 0)
        def _():
            o_ref[...] = jnp.zeros_like(o_ref)

        o_ref[...] += loss
    return kernel


@functools.partial(jax.jit,
                   static_argnames=("method", "reduction", "box_form",
                                    "block_rows"))
def iou_loss(p_boxes, t_boxes, weights=None, *,
             method: str = "log_iou", reduction=None,
             box_form: str = "d_ltrb", block_rows=None):
    """JAX/Pallas equivalent of tensormonk IOULoss.forward."""
    assert method in METHODS
    assert box_form in ("d_ltrb", "cxcywh")
    assert reduction in (None, "sum", "mean")
    # TODO(synk): the PyTorch module's data-dependent input validation
    # (offsets >= 0 / widths > 0 asserts) needs a host sync and is not
    # reproduced here.

    is_offsets = box_form == "d_ltrb"
    has_weights = weights is not None

    p = p_boxes.reshape(-1, 4).astype(jnp.float32)
    t = t_boxes.reshape(-1, 4).astype(jnp.float32)
    assert p.shape[0] == t.shape[0]
    n = p.shape[0]

    # Tile geometry: box index -> (row, lane) with lane width 128.
    m = max(1, -(-n // 128))                       # rows of 128 boxes
    bm = _round_up(m, 8) if block_rows is None else int(block_rows)
    bm = min(_BM_MAX, max(8, _round_up(bm, 8)))
    m_pad = _round_up(m, bm)
    n_pad = m_pad * 128
    grid = m_pad // bm

    # Single glue pass: transpose, fuse p/t into one stream, pad, reshape.
    pt = jnp.concatenate([p.T, t.T], axis=0)        # (8, n)
    pt = jnp.pad(pt, ((0, 0), (0, n_pad - n)))      # (8, n_pad)
    pt = pt.reshape(8, m_pad, 128)

    args = [pt]
    in_specs = [pl.BlockSpec((8, bm, 128), lambda i: (0, i, 0))]
    if has_weights:
        w = jnp.pad(weights.reshape(-1).astype(jnp.float32), (0, n_pad - n))
        args.append(w.reshape(m_pad, 128))
        in_specs.append(pl.BlockSpec((bm, 128), lambda i: (i, 0)))

    if reduction is None:
        kernel = _make_perbox_kernel(method, is_offsets, has_weights)
        out = pl.pallas_call(
            kernel,
            out_shape=jax.ShapeDtypeStruct((m_pad, 128), jnp.float32),
            grid=(grid,),
            in_specs=in_specs,
            out_specs=pl.BlockSpec((bm, 128), lambda i: (i, 0)),
            compiler_params=pltpu.CompilerParams(
                dimension_semantics=("parallel",)),
        )(*args)
        return out.reshape(-1)[:n]

    # Fused reduction: output block is a resident (bm, 128) accumulator.
    kernel = _make_reduce_kernel(method, is_offsets, has_weights, n, bm)
    partial = pl.pallas_call(
        kernel,
        out_shape=jax.ShapeDtypeStruct((bm, 128), jnp.float32),
        grid=(grid,),
        in_specs=in_specs,
        out_specs=pl.BlockSpec((bm, 128), lambda i: (0, 0)),
        compiler_params=pltpu.CompilerParams(
            dimension_semantics=("arbitrary",)),
    )(*args)
    total = jnp.sum(partial)
    if reduction == "sum":
        return total
    return total / n


def _iou_loss_ref(p_boxes, t_boxes, weights=None, *,
                  method="log_iou", reduction=None, box_form="d_ltrb"):
    """Pure-JAX reference mirroring the PyTorch module, for validation."""
    p = p_boxes.reshape(-1, 4).astype(jnp.float32)
    t = t_boxes.reshape(-1, 4).astype(jnp.float32)
    if box_form == "d_ltrb":
        p_dl, p_dt, p_dr, p_db = [p[:, i] for i in range(4)]
        t_dl, t_dt, t_dr, t_db = [t[:, i] for i in range(4)]
        inter = (jnp.minimum(p_dl, t_dl) + jnp.minimum(p_dr, t_dr)) * \
                (jnp.minimum(p_dt, t_dt) + jnp.minimum(p_db, t_db))
        p_area = (p_dl + p_dr) * (p_dt + p_db)
        t_area = (t_dl + t_dr) * (t_dt + t_db)
        union = p_area + t_area - inter
        ac = (jnp.maximum(p_dl, t_dl) + jnp.maximum(p_dr, t_dr)) * \
             (jnp.maximum(p_dt, t_dt) + jnp.maximum(p_db, t_db))
    else:
        p_cx, p_cy, p_w, p_h = [p[:, i] for i in range(4)]
        t_cx, t_cy, t_w, t_h = [t[:, i] for i in range(4)]
        inter = (jnp.minimum(p_cx + p_w, t_cx + t_w) -
                 jnp.maximum(p_cx - p_w, t_cx - t_w)) * \
                (jnp.minimum(p_cy + p_h, t_cy + t_h) -
                 jnp.maximum(p_cy - p_h, t_cy - t_h))
        p_area = p_w * 2 * (p_h * 2)
        t_area = t_w * 2 * (t_h * 2)
        union = p_area + t_area - inter
        ac = (jnp.maximum(p_cx + p_w, t_cx + t_w) -
              jnp.minimum(p_cx - p_w, t_cx - t_w)) * \
             (jnp.maximum(p_cy + p_h, t_cy + t_h) -
              jnp.minimum(p_cy - p_h, t_cy - t_h))
    ious = inter / (union + 1e-08)
    if method in ("giou", "log_giou"):
        ious = ious - (ac - union) / (ac + 1e-08)
    if method in ("iou", "giou"):
        loss = 1 - ious
    else:
        loss = -jnp.log(jnp.clip(ious, 1e-08, 1.0))
    if weights is not None:
        loss = loss * weights.reshape(-1)
    if reduction == "sum":
        return loss.sum()
    elif reduction == "mean":
        return loss.mean()
    return loss


if __name__ == "__main__":
    key = jax.random.PRNGKey(0)
    k1, k2, k3, k4, k5 = jax.random.split(key, 5)

    # Small shapes: (batch=2, boxes=8, 4) in d_ltrb form (non-negative offsets).
    p_boxes = jnp.abs(jax.random.normal(k1, (2, 8, 4), jnp.float32)) * 4.0
    t_boxes = jnp.abs(jax.random.normal(k2, (2, 8, 4), jnp.float32)) * 4.0
    weights = jnp.abs(jax.random.normal(k3, (16, 1), jnp.float32))

    # Default module config: method="log_iou", reduction=None, box_form="d_ltrb".
    out = iou_loss(p_boxes, t_boxes, method="log_iou", reduction=None,
                   box_form="d_ltrb")
    jax.block_until_ready(out)
    ref = _iou_loss_ref(p_boxes, t_boxes, method="log_iou", reduction=None,
                        box_form="d_ltrb")
    assert out.shape == ref.shape == (16,)
    assert jnp.allclose(out, ref, rtol=1e-5, atol=1e-5), (out, ref)

    # giou + weights + fused mean reduction.
    out_g = iou_loss(p_boxes, t_boxes, weights, method="giou",
                     reduction="mean", box_form="d_ltrb")
    jax.block_until_ready(out_g)
    ref_g = _iou_loss_ref(p_boxes, t_boxes, weights, method="giou",
                          reduction="mean", box_form="d_ltrb")
    assert jnp.allclose(out_g, ref_g, rtol=1e-5, atol=1e-5), (out_g, ref_g)

    # cxcywh form, log_giou, per-box output (positive widths/heights).
    cxy = jax.random.normal(k4, (2, 8, 2), jnp.float32) * 4.0
    wh = jnp.abs(jax.random.normal(k5, (2, 8, 2), jnp.float32)) * 2.0 + 0.1
    p_c = jnp.concatenate([cxy, wh], axis=-1)
    t_c = jnp.concatenate([cxy * 0.9 + 0.1, wh * 1.1], axis=-1)
    out_c = iou_loss(p_c, t_c, method="log_giou", reduction=None,
                     box_form="cxcywh")
    jax.block_until_ready(out_c)
    ref_c = _iou_loss_ref(p_c, t_c, method="log_giou", reduction=None,
                          box_form="cxcywh")
    assert jnp.allclose(out_c, ref_c, rtol=1e-5, atol=1e-5), (out_c, ref_c)

    # Force a multi-step grid (block_rows=8 -> 2 grid steps at N=2048) to
    # exercise the pipelined / accumulator paths while keeping shapes small.
    kp, kt, kw = jax.random.split(jax.random.PRNGKey(1), 3)
    p_big = jnp.abs(jax.random.normal(kp, (2048, 4), jnp.float32)) * 4.0
    t_big = jnp.abs(jax.random.normal(kt, (2048, 4), jnp.float32)) * 4.0
    w_big = jnp.abs(jax.random.normal(kw, (2048,), jnp.float32))

    out_b = iou_loss(p_big, t_big, method="log_iou", reduction=None,
                     box_form="d_ltrb", block_rows=8)
    jax.block_until_ready(out_b)
    ref_b = _iou_loss_ref(p_big, t_big, method="log_iou", reduction=None,
                          box_form="d_ltrb")
    assert jnp.allclose(out_b, ref_b, rtol=1e-5, atol=1e-5)

    out_s = iou_loss(p_big, t_big, w_big, method="giou", reduction="sum",
                     box_form="d_ltrb", block_rows=8)
    jax.block_until_ready(out_s)
    ref_s = _iou_loss_ref(p_big, t_big, w_big, method="giou", reduction="sum",
                          box_form="d_ltrb")
    assert jnp.allclose(out_s, ref_s, rtol=1e-4, atol=1e-4), (out_s, ref_s)

    print("KERNEL_OK")
</pallas_src>

<mosaic_0001>
module attributes {stable_mosaic.version = 11 : i64} {
  func.func @kernel(%arg0: i32, %arg1: memref<8x8x128xf32, #tpu.memory_space<vmem>>, %arg2: memref<8x128xf32, #tpu.memory_space<vmem>>) attributes {dimension_semantics = [#tpu.dimension_semantics<parallel>], iteration_bounds = array<i64: 1>, scalar_prefetch = 0 : i64, scratch_operands = 0 : i64, tpu.core_type = #tpu.core_type<tc>, window_params = [{transform_indices = @transform_0, window_bounds = array<i64: 8, 8, 128>}, {transform_indices = @transform_1, window_bounds = array<i64: 8, 128>}]} {
    %c0 = arith.constant 0 : index
    %c0_0 = arith.constant 0 : index
    %c0_1 = arith.constant 0 : index
    %0 = vector.load %arg1[%c0, %c0_0, %c0_1] : memref<8x8x128xf32, #tpu.memory_space<vmem>>, vector<1x8x128xf32>
    %1 = vector.shape_cast %0 : vector<1x8x128xf32> to vector<8x128xf32>
    %c1 = arith.constant 1 : index
    %c0_2 = arith.constant 0 : index
    %c0_3 = arith.constant 0 : index
    %2 = vector.load %arg1[%c1, %c0_2, %c0_3] : memref<8x8x128xf32, #tpu.memory_space<vmem>>, vector<1x8x128xf32>
    %3 = vector.shape_cast %2 : vector<1x8x128xf32> to vector<8x128xf32>
    %c2 = arith.constant 2 : index
    %c0_4 = arith.constant 0 : index
    %c0_5 = arith.constant 0 : index
    %4 = vector.load %arg1[%c2, %c0_4, %c0_5] : memref<8x8x128xf32, #tpu.memory_space<vmem>>, vector<1x8x128xf32>
    %5 = vector.shape_cast %4 : vector<1x8x128xf32> to vector<8x128xf32>
    %c3 = arith.constant 3 : index
    %c0_6 = arith.constant 0 : index
    %c0_7 = arith.constant 0 : index
    %6 = vector.load %arg1[%c3, %c0_6, %c0_7] : memref<8x8x128xf32, #tpu.memory_space<vmem>>, vector<1x8x128xf32>
    %7 = vector.shape_cast %6 : vector<1x8x128xf32> to vector<8x128xf32>
    %c4 = arith.constant 4 : index
    %c0_8 = arith.constant 0 : index
    %c0_9 = arith.constant 0 : index
    %8 = vector.load %arg1[%c4, %c0_8, %c0_9] : memref<8x8x128xf32, #tpu.memory_space<vmem>>, vector<1x8x128xf32>
    %9 = vector.shape_cast %8 : vector<1x8x128xf32> to vector<8x128xf32>
    %c5 = arith.constant 5 : index
    %c0_10 = arith.constant 0 : index
    %c0_11 = arith.constant 0 : index
    %10 = vector.load %arg1[%c5, %c0_10, %c0_11] : memref<8x8x128xf32, #tpu.memory_space<vmem>>, vector<1x8x128xf32>
    %11 = vector.shape_cast %10 : vector<1x8x128xf32> to vector<8x128xf32>
    %c6 = arith.constant 6 : index
    %c0_12 = arith.constant 0 : index
    %c0_13 = arith.constant 0 : index
    %12 = vector.load %arg1[%c6, %c0_12, %c0_13] : memref<8x8x128xf32, #tpu.memory_space<vmem>>, vector<1x8x128xf32>
    %13 = vector.shape_cast %12 : vector<1x8x128xf32> to vector<8x128xf32>
    %c7 = arith.constant 7 : index
    %c0_14 = arith.constant 0 : index
    %c0_15 = arith.constant 0 : index
    %14 = vector.load %arg1[%c7, %c0_14, %c0_15] : memref<8x8x128xf32, #tpu.memory_space<vmem>>, vector<1x8x128xf32>
    %15 = vector.shape_cast %14 : vector<1x8x128xf32> to vector<8x128xf32>
    %16 = arith.minimumf %1, %9 : vector<8x128xf32>
    %17 = arith.minimumf %5, %13 : vector<8x128xf32>
    %18 = arith.addf %16, %17 : vector<8x128xf32>
    %19 = arith.minimumf %3, %11 : vector<8x128xf32>
    %20 = arith.minimumf %7, %15 : vector<8x128xf32>
    %21 = arith.addf %19, %20 : vector<8x128xf32>
    %22 = arith.mulf %18, %21 : vector<8x128xf32>
    %23 = arith.addf %1, %5 : vector<8x128xf32>
    %24 = arith.addf %3, %7 : vector<8x128xf32>
    %25 = arith.mulf %23, %24 : vector<8x128xf32>
    %26 = arith.addf %9, %13 : vector<8x128xf32>
    %27 = arith.addf %11, %15 : vector<8x128xf32>
    %28 = arith.mulf %26, %27 : vector<8x128xf32>
    %29 = arith.addf %25, %28 : vector<8x128xf32>
    %30 = arith.subf %29, %22 : vector<8x128xf32>
    %cst = arith.constant 9.99999993E-9 : f32
    %31 = vector.broadcast %cst : f32 to vector<8x128xf32>
    %32 = arith.addf %30, %31 : vector<8x128xf32>
    %33 = arith.divf %22, %32 : vector<8x128xf32>
    %cst_16 = arith.constant 9.99999993E-9 : f32
    %cst_17 = arith.constant 1.000000e+00 : f32
    %34 = vector.broadcast %cst_16 : f32 to vector<8x128xf32>
    %35 = arith.maximumf %34, %33 : vector<8x128xf32>
    %36 = vector.broadcast %cst_17 : f32 to vector<8x128xf32>
    %37 = arith.minimumf %36, %35 : vector<8x128xf32>
    %38 = math.log %37 : vector<8x128xf32>
    %cst_18 = arith.constant 0.000000e+00 : f32
    %39 = vector.broadcast %cst_18 : f32 to vector<8x128xf32>
    %40 = arith.subf %39, %38 : vector<8x128xf32>
    %c0_19 = arith.constant 0 : index
    %c0_20 = arith.constant 0 : index
    %41 = vector.load %arg2[%c0_19, %c0_20] : memref<8x128xf32, #tpu.memory_space<vmem>>, vector<8x128xf32>
    tpu.vector_store %arg2[%c0_19, %c0_20], %40 {strides = array<i32>} : memref<8x128xf32, #tpu.memory_space<vmem>>, vector<8x128xf32>,
    return
  }
  func.func @transform_0(%arg0: i32) -> (i32, i32, i32) {
    %c0_i32 = arith.constant 0 : i32
    %c0_i32_0 = arith.constant 0 : i32
    %c0_i32_1 = arith.constant 0 : i32
    return %c0_i32, %arg0, %c0_i32_0 : i32, i32, i32
  }
  func.func @transform_1(%arg0: i32) -> (i32, i32) {
    %c0_i32 = arith.constant 0 : i32
    %c0_i32_0 = arith.constant 0 : i32
    return %arg0, %c0_i32 : i32, i32
  }
}

</mosaic_0001>

<bundles_post_ra>
// kernel: iou_loss.1
= control target key start
LH: loop header
LB: loop body
LE: loop exit
PB: predicated region body
PF: predicated region fallthrough
CT: control target
= control target key end

     0   :  { %s99_s0 = inlined_call_operand.vmem [shape: f32[8,8,128], index: 0, kind: input, shape index: {}]   ;;  %s100_s1 = inlined_call_operand.vmem [shape: f32[8,128], index: 1, kind: output, shape index: {}]  }
   0x1   :  { %v8_v0 = vld [vmem:[%s99_s0] sm:$0xff]  ;;  %v51_v1 = vld [vmem:[%s99_s0 + $0x8] sm:$0xff]  ;;  %v52_v2 = vld [vmem:[%s99_s0 + $0x10] sm:$0xff] }
   0x2   :  { %v53_v3 = vld [vmem:[%s99_s0 + $0x18] sm:$0xff]  ;;  %v54_v4 = vld [vmem:[%s99_s0 + $0x20] sm:$0xff]  ;;  %v55_v5 = vld [vmem:[%s99_s0 + $0x28] sm:$0xff]  ;;  %v30_v6 = vadd.f32 %v52_v2, %v8_v0 }
   0x3   :  { %v56_v7 = vld [vmem:[%s99_s0 + $0x30] sm:$0xff]  ;;  %v57_v8 = vld [vmem:[%s99_s0 + $0x38] sm:$0xff]  ;;  %v23_v9 = vmin.f32 %v8_v0, %v54_v4  ;;  %v26_v10 = vmin.f32 %v51_v1, %v55_v5  ;;  %v31_v11 = vadd.f32 %v53_v3, %v51_v1 }
   0x4   :  { %v24_v12 = vmin.f32 %v52_v2, %v56_v7  ;;  %v27_v13 = vmin.f32 %v53_v3, %v57_v8  ;;  %v33_v14 = vadd.f32 %v56_v7, %v54_v4  ;;  %v34_v15 = vadd.f32 %v57_v8, %v55_v5 }
   0x5   :  { %v32_v16 = vmul.f32 %v31_v11, %v30_v6 }
   0x6   :  { %v25_v17 = vadd.f32 %v24_v12, %v23_v9  ;;  %v28_v18 = vadd.f32 %v27_v13, %v26_v10  ;;  %v35_v19 = vmul.f32 %v34_v15, %v33_v14 }
   0x8   :  { %v29_v20 = vmul.f32 %v28_v18, %v25_v17  ;;  %v36_v21 = vadd.f32 %v35_v19, %v32_v16 }
   0xa   :  { %v37_v22 = vsub.f32 %v36_v21, %v29_v20 }
   0xc   :  { %v38_v23 = vadd.f32 1e-08, %v37_v22 }
   0xe   :  { %58 = vrcp.f32 %v38_v23 }
  0x18   :  { %v59_v24 = vpop.eup %58 }
  0x19   :  { %v40_v25 = vmul.f32 %v59_v24, %v29_v20 }
  0x1b   :  { %v41_v26 = vmax.f32 %v40_v25, 1e-08 }
  0x1d   :  { %v42_v27 = vmin.f32 %v41_v26, 1.0 }
  0x1f   :  { %60 = vlog2.f32 %v42_v27 }
  0x29   :  { %v61_v28 = vpop.eup %60 }
  0x2a   :  { %v44_v29 = vmul.f32 0.6931472, %v61_v28 }
  0x2c   :  { %v45_v30 = vsub.f32 0.0, %v44_v29 }
  0x2e   :  { %46 = vst [vmem:[%s100_s1] sm:$0xff] %v45_v30 }

</bundles_post_ra>
